<compile_context>
chip_gen: v5e
topology: v5e:2x2
jax: 0.10.0
libtpu: 0.0.40
codegen_flags: <defaults>
</compile_context>

<pallas_src>
import jax
import jax.numpy as jnp
import numpy as np
from jax.experimental import pallas as pl
from jax.experimental.pallas import tpu as pltpu


def _round_up(v, m):
    return (v + m - 1) // m * m


# ---------------------------------------------------------------------------
# RHS kernels (row-tiled over N): everything that does NOT need the (N,N) adjacency.
#   R = d * (Xp + Bhat@Za)        (matmul dtype; RHS of the single Ahat matmul)
#   C = (Bhat@Zp + d*R) / 3       (f32; self-loop + Bhat-only terms)
# ---------------------------------------------------------------------------
def _rhs_full_kernel(x_ref, z_ref, bself_ref, wx_ref, wc_ref,
                     d_ref, drow_ref, dcol_ref, r_ref, c_ref):
    F = r_ref.shape[1]
    xp = jnp.dot(x_ref[...], wx_ref[...], preferred_element_type=jnp.float32)   # (tmr, F)
    zc = jnp.dot(z_ref[...], wc_ref[...], preferred_element_type=jnp.float32)   # [Z@Wz | Z@Wa]
    v = (dcol_ref[...] * zc).astype(bself_ref.dtype)                             # Dcol @ Zc
    u = drow_ref[...] * jnp.dot(bself_ref[...], v,
                                preferred_element_type=jnp.float32)              # Bhat @ [Zp|Za]
    zp = u[:, :F]
    t = xp + u[:, F:]                       # fused RHS for the single Ahat matmul
    d = d_ref[...]
    r = d * t
    r_ref[...] = r.astype(r_ref.dtype)
    c_ref[...] = (zp + d * r) * (1.0 / 3.0)   # d*r = d^2*t is the A self-loop term


def _rhs_simple_kernel(x_ref, wx_ref, d_ref, r_ref, c_ref):
    # out = Ahat@(x@Wx) = C + A'@R  with  R = d*(x@Wx),  C = d*R,  A' = d·A
    xp = jnp.dot(x_ref[...], wx_ref[...], preferred_element_type=jnp.float32)
    d = d_ref[...]
    r = d * xp
    r_ref[...] = r.astype(r_ref.dtype)
    c_ref[...] = d * r


# ---------------------------------------------------------------------------
# Propagation kernel:  out = C + A' @ R     (A' already carries the d or d/3 row scale)
# grid = (rows "parallel", k "arbitrary"); A streamed (tm,tk); R VMEM-resident.
# ---------------------------------------------------------------------------
def _make_prop_kernel(tk):
    def kernel(a_ref, r_ref, c_ref, o_ref, acc_ref):
        @pl.when(pl.program_id(1) == 0)
        def _():
            acc_ref[...] = jnp.zeros_like(acc_ref)

        off = pl.multiple_of(pl.program_id(1) * tk, 128)
        acc_ref[...] += jnp.dot(a_ref[...], r_ref[pl.ds(off, tk), :],
                                preferred_element_type=jnp.float32)

        @pl.when(pl.program_id(1) == pl.num_programs(1) - 1)
        def _():
            o_ref[...] = (c_ref[...] + acc_ref[...]).astype(o_ref.dtype)
    return kernel


def _propagate(a_p, r_p, c_p, tm, tk):
    Nr, Nc = a_p.shape
    F = r_p.shape[1]
    dt = jnp.dtype(a_p.dtype).itemsize
    bytes_accessed = int(Nr * Nc * dt + Nc * F * dt + 2 * Nr * F * 4)
    # double-buffered A & C tiles + resident R (x2 buffers) + out + f32 accumulator
    vmem_est = 2 * tm * tk * dt + 2 * Nc * F * dt + 4 * tm * F * 4 + tm * F * 4
    # TODO(synk): fall back to streamed R blocks if resident R outgrows the v7x 64 MiB budget.
    vmem_limit = int(min(max(32 * 2 ** 20, vmem_est * 5 // 4), 64 * 2 ** 20))

    return pl.pallas_call(
        _make_prop_kernel(tk),
        out_shape=jax.ShapeDtypeStruct((Nr, F), jnp.float32),
        grid_spec=pltpu.PrefetchScalarGridSpec(
            num_scalar_prefetch=0,
            grid=(Nr // tm, Nc // tk),
            in_specs=[
                pl.BlockSpec((tm, tk), lambda i, k: (i, k)),   # A tile (streamed once)
                pl.BlockSpec((Nc, F), lambda i, k: (0, 0)),    # R resident (fetched once)
                pl.BlockSpec((tm, F), lambda i, k: (i, 0)),    # C tile (resident over k)
            ],
            out_specs=pl.BlockSpec((tm, F), lambda i, k: (i, 0)),
            scratch_shapes=[pltpu.VMEM((tm, F), jnp.float32)],
        ),
        compiler_params=pltpu.CompilerParams(
            dimension_semantics=("parallel", "arbitrary"),
            vmem_limit_bytes=vmem_limit),
        cost_estimate=pl.CostEstimate(
            flops=2 * Nr * Nc * F, transcendentals=0, bytes_accessed=bytes_accessed),
    )(a_p, r_p, c_p)


def _fit_rows(arr, rows):
    cur = arr.shape[0]
    if cur < rows:
        return jnp.pad(arr, ((0, rows - cur), (0, 0)))
    if cur > rows:
        return arr[:rows]          # only zero pad-rows are dropped (rows >= N always)
    return arr


# ---------------------------------------------------------------------------
# Wrapper: JAX glue (COO scatters, O(E)/O(N) degrees, weight padding) + kernels
# ---------------------------------------------------------------------------
def bcmp_layer1(x, edge_index, wx, wz, walpha, bc_feature=None, bc_assigment=None,
                *, matmul_dtype=jnp.bfloat16, tile_m=1024, tile_k=2048):
    """x: (N, d_in); edge_index: (2, E) int; wx/wz/walpha: PyTorch-style (out, in)."""
    x = jnp.asarray(x, jnp.float32)
    edge_index = jnp.asarray(edge_index, jnp.int32)
    N, d_in = x.shape
    d_out = int(wx.shape[0])
    F = _round_up(max(d_out, 128), 128)          # lane-dense padded feature width
    full = not (bc_feature is None and bc_assigment is None)

    # --- propagation tiling, derived BEFORE the adjacency scatter so A is built
    # --- directly at its padded shape & matmul dtype (single O(N^2) pass over A)
    itemsize = jnp.dtype(matmul_dtype).itemsize
    row_mult = 16 if itemsize < 4 else 8         # bf16 packs two rows per sublane
    tm = _round_up(min(tile_m, N), row_mult)
    if N > row_mult:                             # keep >= 2 row tiles (v7x 2-TC row split)
        tm = min(tm, _round_up(-(-N // 2), row_mult))
    tk = min(_round_up(tile_k, 128), _round_up(N, 128))
    Nr = _round_up(N, tm)
    Nc = _round_up(N, tk)

    # --- O(E)/O(N) degree work straight from the COO list (no extra dense pass over A)
    ones_e = jnp.ones((edge_index.shape[1],), jnp.float32)
    col_deg = jnp.zeros((N,), jnp.float32).at[edge_index[1]].add(ones_e) + 1.0
    d = (col_deg ** -0.5).reshape(N, 1)          # D of Ahat = D (A+I) D

    # Fold the Ahat output-row scale (d, or d/3 for the 3-way mean) into the scattered
    # edge values:  A'[i,j] = scale_i * multiplicity(i,j).  NOTE: bf16 rounds these
    # scales (~2^-9 rel), same order as the bf16 rounding of R; exact in f32 mode.
    a_scale = d * (1.0 / 3.0) if full else d
    edge_vals = a_scale.reshape(-1)[edge_index[0]].astype(matmul_dtype)
    a_p = (jnp.zeros((Nr, Nc), matmul_dtype)
           .at[edge_index[0], edge_index[1]].add(edge_vals))

    # --- RHS kernel inputs (row-tiled over N so large N / v7x VMEM degrade gracefully)
    tmr = min(_round_up(N, 16), 512)
    Nrr = _round_up(N, tmr)
    x_p = jnp.pad(x, ((0, Nrr - N), (0, 0)))
    d_p = jnp.pad(d, ((0, Nrr - N), (0, 0)))
    wx_p = jnp.pad(jnp.asarray(wx, jnp.float32).T, ((0, 0), (0, F - d_out)))   # (d_in, F)

    rhs_params = pltpu.CompilerParams(dimension_semantics=("parallel",),
                                      vmem_limit_bytes=32 * 2 ** 20)
    rhs_out_shape = (jax.ShapeDtypeStruct((Nrr, F), matmul_dtype),
                     jax.ShapeDtypeStruct((Nrr, F), jnp.float32))
    rhs_out_specs = (pl.BlockSpec((tmr, F), lambda i: (i, 0)),
                     pl.BlockSpec((tmr, F), lambda i: (i, 0)))

    if not full:
        r, c = pl.pallas_call(
            _rhs_simple_kernel,
            out_shape=rhs_out_shape,
            grid_spec=pltpu.PrefetchScalarGridSpec(
                num_scalar_prefetch=0, grid=(Nrr // tmr,),
                in_specs=[pl.BlockSpec((tmr, d_in), lambda i: (i, 0)),
                          pl.BlockSpec((d_in, F), lambda i: (0, 0)),
                          pl.BlockSpec((tmr, 1), lambda i: (i, 0))],
                out_specs=rhs_out_specs),
            compiler_params=rhs_params,
        )(x_p, wx_p, d_p)
    else:
        Z = jnp.asarray(bc_feature, jnp.float32)
        M, d_z = Z.shape
        assign = jnp.asarray(bc_assigment, jnp.int32)
        nm = min(N, M)
        # Bself = eye(N, M) + B, built directly at padded rows and in the matmul dtype
        # (entries are exact small integers -> bf16 lossless; halves HBM/VMEM + MXU time).
        # TODO(synk): tile the M (block-cut) axis as well if M ever grows to O(N).
        bself_p = (jnp.zeros((Nrr, M), matmul_dtype)
                   .at[jnp.arange(N), assign].add(jnp.ones((N,), matmul_dtype))
                   .at[jnp.arange(nm), jnp.arange(nm)].add(jnp.ones((nm,), matmul_dtype)))
        # Closed-form Bhat degree normalizers, O(N)+O(M) (no dense reduction over Bself).
        drow = ((1.0 + (jnp.arange(N) < nm).astype(jnp.float32)) ** -0.5).reshape(N, 1)
        drow_p = jnp.pad(drow, ((0, Nrr - N), (0, 0)))
        col_cnt = (jnp.zeros((M,), jnp.float32).at[assign].add(jnp.ones((N,), jnp.float32))
                   + (jnp.arange(M) < nm).astype(jnp.float32))
        dcol = (col_cnt ** -0.5).reshape(M, 1)

        wz_p = jnp.pad(jnp.asarray(wz, jnp.float32).T, ((0, 0), (0, F - d_out)))
        wa_p = jnp.pad(jnp.asarray(walpha, jnp.float32).T, ((0, 0), (0, F - d_out)))
        wc_p = jnp.concatenate([wz_p, wa_p], axis=1)          # (d_z, 2F) = [Wz | Wa]

        r, c = pl.pallas_call(
            _rhs_full_kernel,
            out_shape=rhs_out_shape,
            grid_spec=pltpu.PrefetchScalarGridSpec(
                num_scalar_prefetch=0, grid=(Nrr // tmr,),
                in_specs=[pl.BlockSpec((tmr, d_in), lambda i: (i, 0)),
                          pl.BlockSpec((M, d_z), lambda i: (0, 0)),
                          pl.BlockSpec((tmr, M), lambda i: (i, 0)),
                          pl.BlockSpec((d_in, F), lambda i: (0, 0)),
                          pl.BlockSpec((d_z, 2 * F), lambda i: (0, 0)),
                          pl.BlockSpec((tmr, 1), lambda i: (i, 0)),
                          pl.BlockSpec((tmr, 1), lambda i: (i, 0)),
                          pl.BlockSpec((M, 1), lambda i: (0, 0))],
                out_specs=rhs_out_specs),
            compiler_params=rhs_params,
        )(x_p, Z, bself_p, wx_p, wc_p, d_p, drow_p, dcol)

    out = _propagate(a_p, _fit_rows(r, Nc), _fit_rows(c, Nr), tm, tk)
    return out[:N, :d_out]


# ---------------------------------------------------------------------------
# Pure-JAX dense replica of the PyTorch forward (for verification)
# ---------------------------------------------------------------------------
def _dense_adjacency(edge_index, n):
    vals = jnp.ones((edge_index.shape[1],), jnp.float32)
    return jnp.zeros((n, n), jnp.float32).at[edge_index[0], edge_index[1]].add(vals)


def _reference_full(x, edge_index, wx, wz, walpha, bc_feature, bc_assigment):
    N = x.shape[0]
    M = bc_feature.shape[0]
    A = _dense_adjacency(edge_index, N)
    B = jnp.zeros((N, M), jnp.float32).at[jnp.arange(N), bc_assigment].add(1.0)
    Xp = x @ wx.T
    Zp = bc_feature @ wz.T
    Za = bc_feature @ walpha.T
    Aself = jnp.eye(N) + A
    Bself = jnp.eye(N, M) + B
    D = jnp.diag(jnp.sum(Aself, axis=0) ** -0.5)
    Drow = jnp.diag(jnp.sum(Bself, axis=1) ** -0.5)
    Dcol = jnp.diag(jnp.sum(Bself.T, axis=1) ** -0.5)
    Ahat = D @ Aself @ D
    Bhat = Drow @ Bself @ Dcol
    Xp = Ahat @ Xp
    Zp = Bhat @ Zp
    Za = Ahat @ (Bhat @ Za)
    return (Xp + Zp + Za) / 3.0


def _reference_simple(x, edge_index, wx):
    N = x.shape[0]
    A = _dense_adjacency(edge_index, N)
    Aself = jnp.eye(N) + A
    D = jnp.diag(jnp.sum(Aself, axis=0) ** -0.5)
    Ahat = D @ Aself @ D
    return Ahat @ (x @ wx.T)


if __name__ == "__main__":
    def linear_w(k, fan_in, fan_out):
        bound = 1.0 / np.sqrt(fan_in)
        return jax.random.uniform(k, (fan_out, fan_in), jnp.float32, -bound, bound)

    def run_case(key, N, M, d_in, d_z, d_out, E, check_f32=False, **kw):
        ks = jax.random.split(key, 7)
        x = jax.random.normal(ks[0], (N, d_in), jnp.float32)
        bc_feature = jax.random.normal(ks[1], (M, d_z), jnp.float32)
        edge_index = jax.random.randint(ks[2], (2, E), 0, N, jnp.int32)
        bc_assigment = jax.random.randint(ks[3], (N,), 0, M, jnp.int32)
        wx = linear_w(ks[4], d_in, d_out)
        wz = linear_w(ks[5], d_z, d_out)
        walpha = linear_w(ks[6], d_z, d_out)

        ref = _reference_full(x, edge_index, wx, wz, walpha, bc_feature, bc_assigment)
        ref_s = _reference_simple(x, edge_index, wx)

        # default (bf16 propagation matmul, f32 accumulation)
        out = jax.block_until_ready(
            bcmp_layer1(x, edge_index, wx, wz, walpha, bc_feature, bc_assigment, **kw))
        out_s = jax.block_until_ready(bcmp_layer1(x, edge_index, wx, wz, walpha, **kw))
        np.testing.assert_allclose(np.asarray(out), np.asarray(ref), rtol=2e-2, atol=2e-2)
        np.testing.assert_allclose(np.asarray(out_s), np.asarray(ref_s), rtol=2e-2, atol=2e-2)
        assert out.shape == (N, d_out) and out_s.shape == (N, d_out)

        if check_f32:   # exact-semantics check with an all-f32 pipeline
            out32 = jax.block_until_ready(
                bcmp_layer1(x, edge_index, wx, wz, walpha, bc_feature, bc_assigment,
                            matmul_dtype=jnp.float32, **kw))
            np.testing.assert_allclose(np.asarray(out32), np.asarray(ref),
                                       rtol=1e-4, atol=1e-5)

    key = jax.random.PRNGKey(0)
    k1, k2 = jax.random.split(key)
    # small shapes consistent with the module (single/few-tile grids)
    run_case(k1, N=16, M=8, d_in=8, d_z=8, d_out=32, E=32, check_f32=True)
    # exercise multi row-tile + k-accumulation propagation path with small tiles
    run_case(k2, N=200, M=24, d_in=8, d_z=8, d_out=32, E=600, tile_m=64, tile_k=128)

    print("KERNEL_OK")
</pallas_src>

<mosaic_0001>
module attributes {stable_mosaic.version = 11 : i64} {
  func.func @_rhs_full_kernel(%arg0: i32, %arg1: memref<16x8xf32, #tpu.memory_space<vmem>>, %arg2: memref<8x8xf32, #tpu.memory_space<vmem>>, %arg3: memref<16x8xbf16, #tpu.memory_space<vmem>>, %arg4: memref<8x128xf32, #tpu.memory_space<vmem>>, %arg5: memref<8x256xf32, #tpu.memory_space<vmem>>, %arg6: memref<16x1xf32, #tpu.memory_space<vmem>>, %arg7: memref<16x1xf32, #tpu.memory_space<vmem>>, %arg8: memref<8x1xf32, #tpu.memory_space<vmem>>, %arg9: memref<16x128xbf16, #tpu.memory_space<vmem>>, %arg10: memref<16x128xf32, #tpu.memory_space<vmem>>) attributes {dimension_semantics = [#tpu.dimension_semantics<parallel>], iteration_bounds = array<i64: 1>, scalar_prefetch = 0 : i64, scratch_operands = 0 : i64, tpu.core_type = #tpu.core_type<tc>, window_params = [{transform_indices = @transform_0, window_bounds = array<i64: 16, 8>}, {pipeline_mode = #tpu.pipeline_mode<synchronous>, transform_indices = @transform_1, window_bounds = array<i64: 8, 8>}, {transform_indices = @transform_2, window_bounds = array<i64: 16, 8>}, {pipeline_mode = #tpu.pipeline_mode<synchronous>, transform_indices = @transform_3, window_bounds = array<i64: 8, 128>}, {pipeline_mode = #tpu.pipeline_mode<synchronous>, transform_indices = @transform_4, window_bounds = array<i64: 8, 256>}, {transform_indices = @transform_5, window_bounds = array<i64: 16, 1>}, {transform_indices = @transform_6, window_bounds = array<i64: 16, 1>}, {pipeline_mode = #tpu.pipeline_mode<synchronous>, transform_indices = @transform_7, window_bounds = array<i64: 8, 1>}, {transform_indices = @transform_8, window_bounds = array<i64: 16, 128>}, {transform_indices = @transform_9, window_bounds = array<i64: 16, 128>}]} {
    %c0 = arith.constant 0 : index
    %c0_0 = arith.constant 0 : index
    %0 = vector.load %arg1[%c0, %c0_0] : memref<16x8xf32, #tpu.memory_space<vmem>>, vector<16x8xf32>
    %c0_1 = arith.constant 0 : index
    %c0_2 = arith.constant 0 : index
    %1 = vector.load %arg4[%c0_1, %c0_2] : memref<8x128xf32, #tpu.memory_space<vmem>>, vector<8x128xf32>
    %cst = arith.constant dense<0.000000e+00> : vector<16x128xf32>
    %2 = tpu.matmul %0, %1, %cst {dimension_numbers = #tpu.dot_dimension_numbers<[1], [0], [0], [1], [0, 0, 1, 1], [], []>} : vector<16x8xf32>, vector<8x128xf32>, vector<16x128xf32> -> vector<16x128xf32>
    %c0_3 = arith.constant 0 : index
    %c0_4 = arith.constant 0 : index
    %3 = vector.load %arg2[%c0_3, %c0_4] : memref<8x8xf32, #tpu.memory_space<vmem>>, vector<8x8xf32>
    %c0_5 = arith.constant 0 : index
    %c0_6 = arith.constant 0 : index
    %4 = vector.load %arg5[%c0_5, %c0_6] : memref<8x256xf32, #tpu.memory_space<vmem>>, vector<8x256xf32>
    %cst_7 = arith.constant dense<0.000000e+00> : vector<8x256xf32>
    %5 = tpu.matmul %3, %4, %cst_7 {dimension_numbers = #tpu.dot_dimension_numbers<[1], [0], [0], [1], [0, 0, 1, 1], [], []>} : vector<8x8xf32>, vector<8x256xf32>, vector<8x256xf32> -> vector<8x256xf32>
    %c0_8 = arith.constant 0 : index
    %c0_9 = arith.constant 0 : index
    %6 = vector.load %arg8[%c0_8, %c0_9] : memref<8x1xf32, #tpu.memory_space<vmem>>, vector<8x1xf32>
    %7 = vector.broadcast %6 : vector<8x1xf32> to vector<8x256xf32>
    %8 = arith.mulf %7, %5 : vector<8x256xf32>
    %9 = arith.truncf %8 : vector<8x256xf32> to vector<8x256xbf16>
    %c0_10 = arith.constant 0 : index
    %c0_11 = arith.constant 0 : index
    %10 = vector.load %arg7[%c0_10, %c0_11] : memref<16x1xf32, #tpu.memory_space<vmem>>, vector<16x1xf32>
    %c0_12 = arith.constant 0 : index
    %c0_13 = arith.constant 0 : index
    %11 = vector.load %arg3[%c0_12, %c0_13] : memref<16x8xbf16, #tpu.memory_space<vmem>>, vector<16x8xbf16>
    %cst_14 = arith.constant dense<0.000000e+00> : vector<16x256xf32>
    %12 = tpu.matmul %11, %9, %cst_14 {dimension_numbers = #tpu.dot_dimension_numbers<[1], [0], [0], [1], [0, 0, 1, 1], [], []>} : vector<16x8xbf16>, vector<8x256xbf16>, vector<16x256xf32> -> vector<16x256xf32>
    %13 = vector.broadcast %10 : vector<16x1xf32> to vector<16x256xf32>
    %14 = arith.mulf %13, %12 : vector<16x256xf32>
    %15 = vector.extract_strided_slice %14 {offsets = [0, 0], sizes = [16, 128], strides = [1, 1]} : vector<16x256xf32> to vector<16x128xf32>
    %16 = vector.extract_strided_slice %14 {offsets = [0, 128], sizes = [16, 128], strides = [1, 1]} : vector<16x256xf32> to vector<16x128xf32>
    %17 = arith.addf %2, %16 : vector<16x128xf32>
    %c0_15 = arith.constant 0 : index
    %c0_16 = arith.constant 0 : index
    %18 = vector.load %arg6[%c0_15, %c0_16] : memref<16x1xf32, #tpu.memory_space<vmem>>, vector<16x1xf32>
    %19 = vector.broadcast %18 : vector<16x1xf32> to vector<16x128xf32>
    %20 = arith.mulf %19, %17 : vector<16x128xf32>
    %21 = arith.truncf %20 : vector<16x128xf32> to vector<16x128xbf16>
    %c0_17 = arith.constant 0 : index
    %c0_18 = arith.constant 0 : index
    %22 = vector.load %arg9[%c0_17, %c0_18] : memref<16x128xbf16, #tpu.memory_space<vmem>>, vector<16x128xbf16>
    tpu.vector_store %arg9[%c0_17, %c0_18], %21 {strides = array<i32>} : memref<16x128xbf16, #tpu.memory_space<vmem>>, vector<16x128xbf16>,
    %23 = vector.broadcast %18 : vector<16x1xf32> to vector<16x128xf32>
    %24 = arith.mulf %23, %20 : vector<16x128xf32>
    %25 = arith.addf %15, %24 : vector<16x128xf32>
    %cst_19 = arith.constant 0.333333343 : f32
    %26 = vector.broadcast %cst_19 : f32 to vector<16x128xf32>
    %27 = arith.mulf %25, %26 : vector<16x128xf32>
    %c0_20 = arith.constant 0 : index
    %c0_21 = arith.constant 0 : index
    %28 = vector.load %arg10[%c0_20, %c0_21] : memref<16x128xf32, #tpu.memory_space<vmem>>, vector<16x128xf32>
    tpu.vector_store %arg10[%c0_20, %c0_21], %27 {strides = array<i32>} : memref<16x128xf32, #tpu.memory_space<vmem>>, vector<16x128xf32>,
    return
  }
  func.func @transform_0(%arg0: i32) -> (i32, i32) {
    %c0_i32 = arith.constant 0 : i32
    %c0_i32_0 = arith.constant 0 : i32
    return %arg0, %c0_i32 : i32, i32
  }
  func.func @transform_1(%arg0: i32) -> (i32, i32) {
    %c0_i32 = arith.constant 0 : i32
    %c0_i32_0 = arith.constant 0 : i32
    %c0_i32_1 = arith.constant 0 : i32
    return %c0_i32, %c0_i32_0 : i32, i32
  }
  func.func @transform_2(%arg0: i32) -> (i32, i32) {
    %c0_i32 = arith.constant 0 : i32
    %c0_i32_0 = arith.constant 0 : i32
    return %arg0, %c0_i32 : i32, i32
  }
  func.func @transform_3(%arg0: i32) -> (i32, i32) {
    %c0_i32 = arith.constant 0 : i32
    %c0_i32_0 = arith.constant 0 : i32
    %c0_i32_1 = arith.constant 0 : i32
    return %c0_i32, %c0_i32_0 : i32, i32
  }
  func.func @transform_4(%arg0: i32) -> (i32, i32) {
    %c0_i32 = arith.constant 0 : i32
    %c0_i32_0 = arith.constant 0 : i32
    %c0_i32_1 = arith.constant 0 : i32
    return %c0_i32, %c0_i32_0 : i32, i32
  }
  func.func @transform_5(%arg0: i32) -> (i32, i32) {
    %c0_i32 = arith.constant 0 : i32
    %c0_i32_0 = arith.constant 0 : i32
    return %arg0, %c0_i32 : i32, i32
  }
  func.func @transform_6(%arg0: i32) -> (i32, i32) {
    %c0_i32 = arith.constant 0 : i32
    %c0_i32_0 = arith.constant 0 : i32
    return %arg0, %c0_i32 : i32, i32
  }
  func.func @transform_7(%arg0: i32) -> (i32, i32) {
    %c0_i32 = arith.constant 0 : i32
    %c0_i32_0 = arith.constant 0 : i32
    %c0_i32_1 = arith.constant 0 : i32
    return %c0_i32, %c0_i32_0 : i32, i32
  }
  func.func @transform_8(%arg0: i32) -> (i32, i32) {
    %c0_i32 = arith.constant 0 : i32
    %c0_i32_0 = arith.constant 0 : i32
    return %arg0, %c0_i32 : i32, i32
  }
  func.func @transform_9(%arg0: i32) -> (i32, i32) {
    %c0_i32 = arith.constant 0 : i32
    %c0_i32_0 = arith.constant 0 : i32
    return %arg0, %c0_i32 : i32, i32
  }
}

</mosaic_0001>

<bundles_post_ra>
// kernel: tpu_custom_call.1
= control target key start
LH: loop header
LB: loop body
LE: loop exit
PB: predicated region body
PF: predicated region fallthrough
CT: control target
= control target key end

     0   :  { %15 = vsyncpa [#allocation3], 0  ;;  %vm40_vm0 = vcmask 64512   ;;  %v324_v3 = vmov 0   ;;  %s429_s0 = inlined_call_operand.vmem [shape: f32[16,8], index: 0, kind: input, shape index: {}]   ;;  %s430_s1 = inlined_call_operand.vmem [shape: f32[8,8], index: 1, kind: input, shape index: {}]   ;;  %s431_s2 = inlined_call_operand.vmem [shape: bf16[16,8], index: 2, kind: input, shape index: {}]   ;;  %s432_s3 = inlined_call_operand.vmem [shape: f32[8,128], index: 3, kind: input, shape index: {}]   ;;  %s433_s4 = inlined_call_operand.vmem [shape: f32[8,256], index: 4, kind: input, shape index: {}]   ;;  %s434_s5 = inlined_call_operand.vmem [shape: f32[16,1], index: 5, kind: input, shape index: {}]   ;;  %s435_s6 = inlined_call_operand.vmem [shape: f32[16,1], index: 6, kind: input, shape index: {}]   ;;  %s436_s7 = inlined_call_operand.vmem [shape: f32[8,1], index: 7, kind: input, shape index: {}]   ;;  %s437_s8 = inlined_call_operand.hbm [shape: bf16[16,128], index: 8, kind: output, shape index: {0}]   ;;  %s438_s9 = inlined_call_operand.hbm [shape: f32[16,128], index: 9, kind: output, shape index: {1}]  }
   0x1   :  { %v38_v0 = vld [vmem:[%s433_s4] sm:$0xff]  ;;  %v39_v2 = vld [vmem:[%s433_s4 + $0x8] sm:$0xff]  ;;  %269 = vset.pattern.permute.xlu0 %v324_v3 }
   0x2   :  { %v37_v1 = vld [vmem:[%s430_s1] sm:$0xff]  ;;  %59 = vmatpush.msra.mxu1 %v38_v0 }
   0x3   :  { %v84_v4 = vld [vmem:[%s436_s7] sm:$0xff] }
   0x4   :  { %16 = vsyncpa [#allocation5], 0  ;;  %246 = vmatmul.msk.f32.vlgmr.msra.gmra.mxu1 %vm40_vm0, %v37_v1  ;;  %87 = vperm.xlu0 %269, %v84_v4   ;;  %v94_v5 = vld [vmem:[%s435_s6] sm:$0xff]  ;;  %v95_v8 = vld [vmem:[%s435_s6 + $0x8] sm:$0xff]  ;;  %vm106_vm1 = vcmask 1043456   ;;  %s216_s29 = sshll.u32 %s437_s8, 4  ;;  %s217_s29 = int_to_ptr.hbm [resolvable:$true] %s216_s29 }
   0x5   :  { %79 = vmatpush.msrb.mxu1 %v39_v2  ;;  %270 = vset.pattern.permute.xlu1 %v324_v3  ;;  %v36_v6 = vld [vmem:[%s432_s3] sm:$0xff]  ;;  %v185_v9 = vld [vmem:[%s434_s5 + $0x8] sm:$0xff]  ;;  %s326_s30 = smov [#allocation4]   ;;  %s229_s13 = sshll.u32 %s438_s9, 4  ;;  %s230_s13 = int_to_ptr.hbm [resolvable:$true] %s229_s13 }
   0x6   :  { %271 = vset.pattern.permute.xlu2 %v324_v3  ;;  %v34_v7 = vld [vmem:[%s429_s0] sm:$0xff]  ;;  %176 = vmatpush.msra.mxu0 %v36_v6  ;;  %v35_v11 = vld [vmem:[%s429_s0 + $0x8] sm:$0xff]  ;;  %s325_s0 = smov [#allocation2]   ;;  %s227_s10 = sshll.u32 %s326_s30, 4  ;;  %s228_s10 = int_to_ptr.vmem [resolvable:$true] %s227_s10 }
   0x7   :  { %148 = vperm.xlu1 %270, %v95_v8   ;;  %254 = vmatmul.msk.f32.vlgmr.msra.gmra.mxu0 %vm40_vm0, %v34_v7  ;;  %v184_v10 = vld [vmem:[%s434_s5] sm:$0xff]  ;;  %s327_s8 = smov 64   ;;  %s328_s14 = smov 4  }
   0x8   :  { %193 = vperm.xlu2 %271, %v185_v9   ;;  %v256_v17 = vld [vmem:[%s431_s2] sm:$0xff]  ;;  %s214_s2 = sshll.u32 %s325_s0, 4  ;;  %s329_s15 = smov 128   ;;  %s215_s2 = int_to_ptr.vmem [resolvable:$true] %s214_s2 }
   0x9   :  { %s330_s16 = smov 8  }
   0xc   :  { %247 = vmatmul.msk.f32.vlgmr.msrb.gmra.mxu1 %vm40_vm0, %v37_v1  ;;  %143 = vperm.xlu0 %269, %v94_v5  }
   0xf   :  { %188 = vperm.xlu1 %270, %v184_v10   ;;  %255 = vmatmul.msk.f32.gmra.mxu0 %vm40_vm0, %v35_v11 }
  0x62   :  { %v194_v37 = vpop.permute.xlu2 %193 }
  0x76   :  { %v88_v12 = vpop.permute.xlu0 %87 }
  0x79   :  { %v149_v22 = vpop.permute.xlu1 %148 }
  0x7e   :  { %v144_v24 = vpop.permute.xlu0 %143 }
  0x81   :  { %v61_v13 = vpop.f32.mrf.mxu1  ;;  %v189_v27 = vpop.permute.xlu1 %188 }
  0x82   :  { %v90_v14 = vmul.f32 %v88_v12, %v61_v13 }
  0x84   :  { %v92_v15 = vpack.c.bf16 %v90_v14, %v90_v14  ;;  %v178_v23 = vpop.f32.mrf.mxu0 }
  0x86   :  { %v108_v16 = vsel %vm106_vm1, %v92_v15, 0 }
  0x87   :  { %120 = vmatpush.bf16.msra.mxu2 %v108_v16 }
  0x89   :  { %v81_v18 = vpop.f32.mrf.mxu1 }
  0x8a   :  { %v91_v19 = vmul.f32 %v88_v12, %v81_v18  ;;  %252 = vmatmul.msk.bf16.vlgmr.msra.gmra.mxu2 %vm40_vm0, %v256_v17 }
  0x8c   :  { %v93_v20 = vpack.c.bf16 %v91_v19, %v91_v19  ;;  %v181_v34 = vpop.f32.mrf.mxu0 }
  0x8e   :  { %v111_v21 = vsel %vm106_vm1, %v93_v20, 0 }
  0x8f   :  { %134 = vmatpush.bf16.msra.mxu3 %v111_v21 }
  0x92   :  { %253 = vmatmul.msk.bf16.vlgmr.msra.gmra.mxu3 %vm40_vm0, %v256_v17 }
 0x10d   :  { %v122_v29 = vpop.f32.mrf.mxu2 }
 0x10e   :  { %v151_v31 = vmul.f32 %v144_v24, %v122_v29 }
 0x115   :  { %v136_v25 = vpop.f32.mrf.mxu3  ;;  %v124_v40 = vpop.f32.mrf.mxu2 }
 0x116   :  { %v152_v26 = vmul.f32 %v144_v24, %v136_v25  ;;  %v153_v42 = vmul.f32 %v149_v22, %v124_v40 }
 0x118   :  { %v179_v28 = vadd.f32 %v178_v23, %v152_v26 }
 0x11a   :  { %v196_v30 = vmul.f32 %v189_v27, %v179_v28 }
 0x11c   :  { %v202_v32 = vmul.f32 %v196_v30, %v189_v27 }
 0x11d   :  { %v138_v33 = vpop.f32.mrf.mxu3 }
 0x11e   :  { %v204_v35 = vadd.f32 %v202_v32, %v151_v31  ;;  %v154_v36 = vmul.f32 %v149_v22, %v138_v33 }
 0x120   :  { %v206_v38 = vmul.f32 0.33333334, %v204_v35  ;;  %v182_v39 = vadd.f32 %v181_v34, %v154_v36 }
 0x122   :  { %208 = vst [vmem:[#allocation4] sm:$0xff] %v206_v38  ;;  %v197_v41 = vmul.f32 %v194_v37, %v182_v39 }
 0x124   :  { %v260_v43 = vpack.c.bf16 %v197_v41, %v196_v30  ;;  %v203_v44 = vmul.f32 %v197_v41, %v194_v37 }
 0x126   :  { %261 = vst [vmem:[#allocation2] sm:$0xff] %v260_v43   ;;  %v205_v45 = vadd.f32 %v203_v44, %v153_v42 }
 0x127   :  { %222 = dma.vmem_to_hbm [thread:$0]  %s215_s2, 128, %s217_s29, [#allocation3], %s327_s8, %s327_s8, %s328_s14  }
 0x128   :  { %v207_v46 = vmul.f32 0.33333334, %v205_v45 }
 0x12a   :  { %209 = vst [vmem:[#allocation4 + $0x8] sm:$0xff] %v207_v46 }
 0x12b   :  { %235 = dma.vmem_to_hbm [thread:$0]  %s228_s10, 256, %s230_s13, [#allocation5], %s329_s15, %s329_s15, %s330_s16  }
 0x12c   :  { %320 = dma.done.wait [#allocation3], 128  }
 0x12d   :  { %321 = vsyncadd [#allocation3], 4294967168 }
 0x12e   :  { %322 = dma.done.wait [#allocation5], 256  }
 0x12f   :  { %323 = vsyncadd [#allocation5], 4294967040 }
 0x130   :  { %244 = vsyncpa [#allocation3], 1 }
 0x131   :  { %245 = vsyncpa [#allocation5], 1 }

</bundles_post_ra>
